<compile_context>
chip_gen: v7x
topology: tpu7x:2x2x1
jax: 0.10.0
libtpu: 0.0.40
codegen_flags: <defaults>
</compile_context>

<pallas_src>
import functools

import jax
import jax.numpy as jnp
from jax.experimental import pallas as pl
from jax.experimental.pallas import tpu as pltpu

IN_FEATURES = 3
OUT_FEATURES = 1
LANE = 128                 # TPU lane width
MAX_TILE = 128 * 1024      # lanes per grid step; real HBM traffic ~2 MiB/step
VMEM_LIMIT_BYTES = 32 * 1024 * 1024  # raise v5e's 16 MiB default; fits v7x 64 MiB/TC


def _round_up(n, m):
    return -(-n // m) * m


def linear_kernel(w_ref, b_ref, xt_ref, o_ref):
    # xt_ref: (3, TB) lane-dense tile of x^T   (VMEM)
    # w_ref : (3,)  weights                    (SMEM scalars)
    # b_ref : (1,)  bias                       (SMEM scalar)
    # o_ref : (1, TB) lane-dense output tile   (VMEM)
    #
    # Read each feature row straight from the ref: three strided vlds and
    # broadcast-FMAs, no (8,128)-padded full-tile materialization.
    x0 = xt_ref[0:1, :]
    x1 = xt_ref[1:2, :]
    x2 = xt_ref[2:3, :]
    y = x0 * w_ref[0] + x1 * w_ref[1] + x2 * w_ref[2] + b_ref[0]
    o_ref[...] = y.astype(o_ref.dtype)


@functools.partial(jax.jit, static_argnames=("tile",))
def _forward_padded(xt_pad, w_flat, b_flat, tile):
    """xt_pad: (3, B_pad) f32 with B_pad % tile == 0. Returns (1, B_pad) f32."""
    padded_b = xt_pad.shape[1]
    grid = (padded_b // tile,)
    cost = pl.CostEstimate(
        flops=6 * padded_b,                       # 3 mul + 3 add per sample
        transcendentals=0,
        bytes_accessed=16 * padded_b + 16,        # 12 B/sample in + 4 B/sample out
    )
    return pl.pallas_call(
        linear_kernel,
        out_shape=jax.ShapeDtypeStruct((OUT_FEATURES, padded_b), jnp.float32),
        grid=grid,
        in_specs=[
            # Tiny weight / bias vectors live in SMEM; read as scalars.
            pl.BlockSpec(memory_space=pltpu.MemorySpace.SMEM),
            pl.BlockSpec(memory_space=pltpu.MemorySpace.SMEM),
            # Lane-dense x^T tiles, double-buffered along the batch axis.
            pl.BlockSpec((IN_FEATURES, tile), lambda i: (0, i)),
        ],
        out_specs=pl.BlockSpec((OUT_FEATURES, tile), lambda i: (0, i)),
        compiler_params=pltpu.CompilerParams(
            dimension_semantics=("parallel",),    # lets v7x split across 2 TCs
            vmem_limit_bytes=VMEM_LIMIT_BYTES,
        ),
        cost_estimate=cost,
    )(w_flat, b_flat, xt_pad)


def simple_model_forward(x, w, b):
    """x: (B, 3) f32; w: (1, 3) f32 (torch nn.Linear layout); b: (1,) f32.

    Returns y: (B, 1) f32, equal to x @ w.T + b.
    """
    B = x.shape[0]
    # Pad batch up to a multiple of the lane width.
    lane_b = _round_up(max(B, 1), LANE)

    # Pick a tile so the grid has >=2 (target ~4) steps when the batch is
    # large enough: enables the 2-TC split on v7x and DMA/compute pipelining
    # everywhere, while capping the per-step VMEM footprint at MAX_TILE lanes.
    if lane_b >= 4 * LANE:
        target_steps = 4
    elif lane_b >= 2 * LANE:
        target_steps = 2
    else:
        target_steps = 1
    tile = min(MAX_TILE, _round_up(-(-lane_b // target_steps), LANE))
    padded_b = _round_up(lane_b, tile)

    # Lane-dense repack: features on sublanes, batch on lanes. Single fused
    # pad of the transpose (one copy pass) instead of zero-fill + scatter-set.
    # TODO(synk): ideally the producer hands x over already lane-dense (3, B)
    # so this 12 B/sample repack copy disappears entirely.
    xt = jnp.pad(x.T.astype(jnp.float32), ((0, 0), (0, padded_b - B)))

    y_pad = _forward_padded(
        xt,
        w.reshape(IN_FEATURES).astype(jnp.float32),
        b.reshape(OUT_FEATURES).astype(jnp.float32),
        tile,
    )
    # Slice off padding and restore the (B, 1) PyTorch output layout.
    return y_pad[0, :B].reshape(B, OUT_FEATURES)


def init_params(key):
    # nn.Linear default init: U(-1/sqrt(fan_in), +1/sqrt(fan_in))
    kw, kb = jax.random.split(key)
    bound = 1.0 / jnp.sqrt(jnp.float32(IN_FEATURES))
    w = jax.random.uniform(kw, (OUT_FEATURES, IN_FEATURES),
                           minval=-bound, maxval=bound, dtype=jnp.float32)
    b = jax.random.uniform(kb, (OUT_FEATURES,),
                           minval=-bound, maxval=bound, dtype=jnp.float32)
    return w, b


if __name__ == "__main__":
    key = jax.random.PRNGKey(0)
    k_x, k_p = jax.random.split(key)

    B = 8
    x = jax.random.normal(k_x, (B, IN_FEATURES), dtype=jnp.float32)
    w, b = init_params(k_p)

    y = simple_model_forward(x, w, b)
    y = jax.block_until_ready(y)

    # Reference: same math as torch's x @ W.T + b
    y_ref = x @ w.T + b
    assert y.shape == (B, OUT_FEATURES)
    assert jnp.allclose(y, y_ref, atol=1e-5, rtol=1e-5)

    # Also exercise a multi-tile / multi-step grid path for correctness.
    B2 = 1000
    x2 = jax.random.normal(jax.random.PRNGKey(1), (B2, IN_FEATURES),
                           dtype=jnp.float32)
    y2 = jax.block_until_ready(simple_model_forward(x2, w, b))
    assert y2.shape == (B2, OUT_FEATURES)
    assert jnp.allclose(y2, x2 @ w.T + b, atol=1e-5, rtol=1e-5)

    print("KERNEL_OK")
</pallas_src>

<mosaic_0001>
module attributes {stable_mosaic.version = 11 : i64} {
  func.func @linear_kernel(%arg0: i32, %arg1: memref<3xf32, #tpu.memory_space<smem>>, %arg2: memref<1xf32, #tpu.memory_space<smem>>, %arg3: memref<3x128xf32, #tpu.memory_space<vmem>>, %arg4: memref<1x128xf32, #tpu.memory_space<vmem>>) attributes {dimension_semantics = [#tpu.dimension_semantics<parallel>], iteration_bounds = array<i64: 1>, scalar_prefetch = 0 : i64, scratch_operands = 0 : i64, tpu.core_type = #tpu.core_type<tc>, window_params = [{transform_indices = @transform_0, window_bounds = array<i64: 3>}, {transform_indices = @transform_1, window_bounds = array<i64: 1>}, {transform_indices = @transform_2, window_bounds = array<i64: 3, 128>}, {transform_indices = @transform_3, window_bounds = array<i64: 1, 128>}]} {
    %c0 = arith.constant 0 : index
    %c0_0 = arith.constant 0 : index
    %0 = vector.load %arg3[%c0, %c0_0] : memref<3x128xf32, #tpu.memory_space<vmem>>, vector<1x128xf32>
    %c1 = arith.constant 1 : index
    %c0_1 = arith.constant 0 : index
    %1 = vector.load %arg3[%c1, %c0_1] : memref<3x128xf32, #tpu.memory_space<vmem>>, vector<1x128xf32>
    %c2 = arith.constant 2 : index
    %c0_2 = arith.constant 0 : index
    %2 = vector.load %arg3[%c2, %c0_2] : memref<3x128xf32, #tpu.memory_space<vmem>>, vector<1x128xf32>
    %c0_3 = arith.constant 0 : index
    %3 = memref.load %arg1[%c0_3] : memref<3xf32, #tpu.memory_space<smem>>
    %4 = vector.broadcast %3 : f32 to vector<1x128xf32>
    %5 = arith.mulf %0, %4 : vector<1x128xf32>
    %c1_4 = arith.constant 1 : index
    %6 = memref.load %arg1[%c1_4] : memref<3xf32, #tpu.memory_space<smem>>
    %7 = vector.broadcast %6 : f32 to vector<1x128xf32>
    %8 = arith.mulf %1, %7 : vector<1x128xf32>
    %9 = arith.addf %5, %8 : vector<1x128xf32>
    %c2_5 = arith.constant 2 : index
    %10 = memref.load %arg1[%c2_5] : memref<3xf32, #tpu.memory_space<smem>>
    %11 = vector.broadcast %10 : f32 to vector<1x128xf32>
    %12 = arith.mulf %2, %11 : vector<1x128xf32>
    %13 = arith.addf %9, %12 : vector<1x128xf32>
    %c0_6 = arith.constant 0 : index
    %14 = memref.load %arg2[%c0_6] : memref<1xf32, #tpu.memory_space<smem>>
    %15 = vector.broadcast %14 : f32 to vector<1x128xf32>
    %16 = arith.addf %13, %15 : vector<1x128xf32>
    %c0_7 = arith.constant 0 : index
    %c0_8 = arith.constant 0 : index
    %17 = vector.load %arg4[%c0_7, %c0_8] : memref<1x128xf32, #tpu.memory_space<vmem>>, vector<1x128xf32>
    tpu.vector_store %arg4[%c0_7, %c0_8], %16 {strides = array<i32>} : memref<1x128xf32, #tpu.memory_space<vmem>>, vector<1x128xf32>,
    return
  }
  func.func @transform_0(%arg0: i32) -> i32 {
    %c0_i32 = arith.constant 0 : i32
    %c0_i32_0 = arith.constant 0 : i32
    return %c0_i32 : i32
  }
  func.func @transform_1(%arg0: i32) -> i32 {
    %c0_i32 = arith.constant 0 : i32
    %c0_i32_0 = arith.constant 0 : i32
    return %c0_i32 : i32
  }
  func.func @transform_2(%arg0: i32) -> (i32, i32) {
    %c0_i32 = arith.constant 0 : i32
    %c0_i32_0 = arith.constant 0 : i32
    return %c0_i32, %arg0 : i32, i32
  }
  func.func @transform_3(%arg0: i32) -> (i32, i32) {
    %c0_i32 = arith.constant 0 : i32
    %c0_i32_0 = arith.constant 0 : i32
    return %c0_i32, %arg0 : i32, i32
  }
}

</mosaic_0001>

<bundles_post_ra>
// kernel: _forward_padded.1
= control target key start
LH: loop header
LB: loop body
LE: loop exit
PB: predicated region body
PF: predicated region fallthrough
CT: control target
= control target key end

     0   :  { %9 = vsyncpa [#allocation6], 0  ;;  %s195_s0 = inlined_call_operand.vmem [shape: f32[3], index: 0, kind: input, shape index: {}]   ;;  %s196_s1 = inlined_call_operand.<no memory space> [shape: f32[1], index: 1, kind: input, shape index: {}]   ;;  %s197_s2 = inlined_call_operand.hbm [shape: f32[3,128], index: 2, kind: input, shape index: {}]   ;;  %s198_s3 = inlined_call_operand.hbm [shape: f32[1,128], index: 3, kind: output, shape index: {}]  }
   0x1   :  { %10 = vsyncpa [#allocation4], 0 }
   0x2   :  { %11 = vsyncpa [#allocation5], 0  ;;  %s18_s14 = sshll.u32 %s195_s0, 4  ;;  %s19_s14 = int_to_ptr.vmem [resolvable:$true] %s18_s14 }
   0x3   :  { %s80_s15 = scalar_lea.vmem %s19_s14, 16  ;;  %p85_p1 = scmp.lt.s32.totalorder %s19_s14, %s19_s14 }
   0x4   :  { %p81_p0 = scmp.ne.s32.totalorder %s19_s14, %s80_s15  ;;  %p86_p2 = scmp.lt.s32.totalorder %s80_s15, %s80_s15 }
   0x6   :  { %p87_p3 = por %p86_p2, %p85_p1 }
   0x8   :  { %p88_p4 = pnand %p87_p3, %p81_p0 }
   0xa   :  { %91 = shalt.err (!%p88_p4)
}
   0xb   :  { %s142_s16 = smov [#allocation3]   ;;  %s143_s17 = smov [#allocation7]  }
   0xc   :  { %21 = dma.vmem_to_smem %s19_s14, 16, %s142_s16, [#allocation6]  }
   0xd   :  { %s30_s18 = sshll.u32 %s143_s17, 4  ;;  %s92_s21 = scalar_lea.hbm %s197_s2, 64  ;;  %s31_s18 = int_to_ptr.vmem [resolvable:$true] %s30_s18 }
   0xe   :  { %p93_p5 = scmp.ne.s32.totalorder %s197_s2, %s92_s21  ;;  %p96_p6 = scmp.lt.u32.totalorder %s92_s21, %s197_s2 }
  0x10   :  { %p98_p7 = pnand %p96_p6, %p93_p5 }
  0x12   :  { %101 = shalt.err (!%p98_p7)
}
  0x13   :  { %s102_s25 = scalar_lea.vmem %s31_s18, 64  ;;  %p107_p9 = scmp.lt.s32.totalorder %s31_s18, %s31_s18 }
  0x14   :  { %p103_p8 = scmp.ne.s32.totalorder %s31_s18, %s102_s25  ;;  %p108_p10 = scmp.lt.s32.totalorder %s102_s25, %s102_s25 }
  0x16   :  { %p109_p11 = por %p108_p10, %p107_p9 }
  0x18   :  { %p110_p12 = pnand %p109_p11, %p103_p8 }
  0x1a   :  { %113 = shalt.err (!%p110_p12)
}
  0x1b   :  { %33 = dma.hbm_to_vmem [thread:$0]  %s197_s2, 64, %s31_s18, [#allocation4]  }
  0x1c   :  { %136 = dma.done.wait [#allocation6], 16  }
  0x1d   :  { %137 = vsyncadd [#allocation6], 4294967280 }
  0x1e   :  { %138 = dma.done.wait [#allocation4], 64  }
  0x1f   :  { %139 = vsyncadd [#allocation4], 4294967232 }
  0x20   :  { %40 = sfence }
  0x21   :  { %s44_s28 = sld [smem:[#allocation3]]  ;;  %s75_s29 = sld [smem:[#allocation3 + $0x1]]  ;;  %v41_v0 = vld [vmem:[#allocation7] sm:$0x1]  ;;  %v42_v1 = vld [vmem:[#allocation7 + $0x1] sm:$0x1]  ;;  %v56_v10 = vstv %s196_s1 }
  0x22   :  { %s76_s30 = sld [smem:[#allocation3 + $0x2]]  ;;  %v43_v2 = vld [vmem:[#allocation7 + $0x2] sm:$0x1]  ;;  %s144_s5 = smov [#allocation8]  }
  0x23   :  { %s65_s6 = sshll.u32 %s144_s5, 4  ;;  %s66_s6 = int_to_ptr.vmem [resolvable:$true] %s65_s6 }
  0x24   :  { %s114_s7 = scalar_lea.vmem %s66_s6, 16  ;;  %s118_s8 = scalar_lea.vmem %s66_s6, 32 }
  0x25   :  { %p115_p13 = scmp.ne.s32.totalorder %s66_s6, %s114_s7  ;;  %p119_p0 = scmp.lt.s32.totalorder %s66_s6, %s66_s6 }
  0x26   :  { %p120_p1 = scmp.lt.s32.totalorder %s118_s8, %s114_s7 }
  0x27   :  { %v45_v3 = vstv %s44_s28  ;;  %v48_v4 = vstv %s75_s29 }
  0x28   :  { %v46_v5 = vmul.f32 %v45_v3, %v41_v0  ;;  %v49_v6 = vmul.f32 %v48_v4, %v42_v1  ;;  %v52_v7 = vstv %s76_s30  ;;  %p121_p2 = por %p120_p1, %p119_p0 }
  0x29   :  { %v53_v8 = vmul.f32 %v52_v7, %v43_v2 }
  0x2a   :  { %v50_v9 = vadd.f32 %v49_v6, %v46_v5  ;;  %p122_p3 = pnand %p121_p2, %p115_p13 }
  0x2c   :  { %v54_v11 = vadd.f32 %v53_v8, %v50_v9 }
  0x2e   :  { %v57_v12 = vadd.f32 %v56_v10, %v54_v11 }
  0x30   :  { %58 = vst [vmem:[#allocation8] sm:$0x1] %v57_v12 }
  0x31   :  { %125 = shalt.err (!%p122_p3)
}
  0x32   :  { %s126_s11 = scalar_lea.hbm %s198_s3, 16 }
  0x33   :  { %p127_p4 = scmp.ne.s32.totalorder %s198_s3, %s126_s11  ;;  %p130_p5 = scmp.lt.u32.totalorder %s126_s11, %s198_s3 }
  0x35   :  { %p132_p6 = pnand %p130_p5, %p127_p4 }
  0x37   :  { %135 = shalt.err (!%p132_p6)
}
  0x38   :  { %68 = dma.vmem_to_hbm [thread:$0]  %s66_s6, 16, %s198_s3, [#allocation5]  }
  0x39   :  { %140 = dma.done.wait [#allocation5], 16  }
  0x3a   :  { %141 = vsyncadd [#allocation5], 4294967280 }
  0x3b   :  { %72 = vsyncpa [#allocation4], 1 }
  0x3c   :  { %73 = vsyncpa [#allocation5], 1 }
  0x3d   :  { %74 = vsyncpa [#allocation6], 1 }

</bundles_post_ra>
